<compile_context>
chip_gen: v7x
topology: tpu7x:2x2x1
jax: 0.10.0
libtpu: 0.0.40
codegen_flags: <defaults>
</compile_context>

<pallas_src>
import functools
import math

import jax
import jax.numpy as jnp
from jax.experimental import pallas as pl
from jax.experimental.pallas import tpu as pltpu


# ----------------------------------------------------------------------------
# Helpers
# ----------------------------------------------------------------------------
def _round_up(x, m):
    return -(-x // m) * m


def _vmem_budget_bytes():
    """Budget for all (double-buffered) blocks of one pallas_call.

    Derived from the chip's physical VMEM (v5e/v6e 128 MiB, v7x 64 MiB) and
    kept at <= half of physical, capped at 48 MiB.
    """
    try:
        phys = pltpu.get_tpu_info().vmem_capacity_bytes
    except Exception:
        phys = 64 * 1024 * 1024          # conservative (v7x-sized) fallback
    return min(phys // 2, 48 * 1024 * 1024)


def _channel_contract(w, x2d, c_in, use_mxu):
    """(C_out, C_in) @ (C_in, M) -> (C_out, M), f32 accumulation."""
    if use_mxu:
        return jnp.dot(w, x2d, preferred_element_type=jnp.float32)
    # Tiny K: a few VPU broadcast-FMAs beat pushing a K<=8 matmul through the
    # MXU (the op is HBM-bound anyway; this just frees the MXU slot).
    y = w[:, 0:1] * x2d[0:1, :]
    for i in range(1, c_in):
        y = y + w[:, i:i + 1] * x2d[i:i + 1, :]
    return y


# ----------------------------------------------------------------------------
# Kernel bodies
# ----------------------------------------------------------------------------
def _conv_s1_kernel(x_ref, w_ref, b_ref, o_ref, *, c_in, use_mxu):
    # x_ref: (C_in, TP) pixels on the lane axis; w_ref: (C_out, C_in) with BN
    # scale folded in; b_ref: (C_out, 1); o_ref: (C_out, TP).
    x = x_ref[...].astype(jnp.float32)
    y = _channel_contract(w_ref[...], x, c_in, use_mxu)
    o_ref[...] = (y + b_ref[...]).astype(o_ref.dtype)


def _conv_strided_kernel(x_ref, s_ref, w_ref, b_ref, o_ref, *, c_in, th, wo,
                         use_mxu):
    # Stride-fused path.
    #   x_ref: (C_in, th, s*W) block of th "super rows" (each super row is
    #          `stride` consecutive input rows of the original image).
    #   s_ref: (s*W, Wo) 0/1 matrix selecting input row 0 and every stride-th
    #          column of a super row (the 2-D spatial subsample, done on MXU).
    #   o_ref: (C_out, th*Wo) lane-dense output block.
    w = w_ref[...]
    s = s_ref[...]
    b = b_ref[...]
    for h in range(th):                        # static unroll over output rows
        xh = x_ref[:, h, :].astype(jnp.float32)                    # (C_in, sW)
        xs = jnp.dot(xh, s, preferred_element_type=jnp.float32)    # (C_in, Wo)
        yh = _channel_contract(w, xs, c_in, use_mxu) + b           # (C_out, Wo)
        o_ref[:, h * wo:(h + 1) * wo] = yh.astype(o_ref.dtype)


# ----------------------------------------------------------------------------
# Tile choosers
# ----------------------------------------------------------------------------
def _pick_pixel_tile(N, P, c_in, c_out, itemsize, budget):
    """Lane-aligned pixel tile for the stride-1 path (balanced, >=2 programs)."""
    if P <= 128:
        return P                                    # single full-dim block
    fixed = 2 * 4 * (c_out * c_in + c_out)          # dbuf weight + bias
    per_px = 2 * itemsize * (c_in + c_out)          # dbuf x + out columns
    if budget > fixed + per_px * 128:
        tp_cap = ((budget - fixed) // per_px) // 128 * 128
    else:
        tp_cap = 128
    want_blocks = 1 if N >= 2 else 2                # keep both v7x cores busy
    n_blocks = max(pl.cdiv(P, tp_cap), want_blocks)
    if n_blocks == 1:
        return P
    return min(_round_up(pl.cdiv(P, n_blocks), 128), _round_up(P, 128))


def _pick_row_tile(N, Ho, Wo, sW, c_in, c_out, itemsize, budget):
    """Output-row tile for the stride-fused path.

    Legal tiles: th == Ho (full-dim blocks), or th a multiple of `step` so the
    x block's sublane dim (th) is a multiple of 8 AND the lane-dense output
    block (th*Wo) is a multiple of 128.  Returns None when no legal tiling
    fits the budget (caller falls back to the pre-sliced stride-1 path).
    """
    g = 128 // math.gcd(Wo, 128)
    step = 8 * g // math.gcd(8, g)                        # lcm(8, 128/gcd(Wo,128))
    fixed = 2 * 4 * (c_out * c_in + c_out + sW * Wo)      # dbuf weight, bias, sel
    per_row = 2 * itemsize * (c_in * sW + c_out * Wo)     # dbuf x + out per row
    max_rows = (budget - fixed) // per_row if budget > fixed else 0
    if max_rows >= Ho:
        if N >= 2 or Ho < 2 * step:
            return Ho
        th = _round_up(pl.cdiv(Ho, 2), step)              # split rows across cores
        return th if th < Ho else Ho
    th = (max_rows // step) * step
    if th < step:
        return None
    n_rb = pl.cdiv(Ho, th)
    return max(step, _round_up(pl.cdiv(Ho, n_rb), step))  # balance the tiles


# ----------------------------------------------------------------------------
# pallas_call wrappers
# ----------------------------------------------------------------------------
def _conv1x1_bn_s1(x_ncp, w_scaled, bias, *, c_out, out_dtype, budget):
    """x_ncp: (N, C_in, P) with P = Ho*Wo on the lane axis."""
    N, c_in, P = x_ncp.shape
    tp = _pick_pixel_tile(N, P, c_in, c_out, x_ncp.dtype.itemsize, budget)
    n_pb = pl.cdiv(P, tp)
    use_mxu = c_in > 8
    kernel = functools.partial(_conv_s1_kernel, c_in=c_in, use_mxu=use_mxu)
    cost = pl.CostEstimate(
        flops=2 * N * P * c_in * c_out,
        transcendentals=0,
        bytes_accessed=(x_ncp.dtype.itemsize * N * c_in * P
                        + jnp.dtype(out_dtype).itemsize * N * c_out * P
                        + 4 * (c_in * c_out + c_out)))
    return pl.pallas_call(
        kernel,
        out_shape=jax.ShapeDtypeStruct((N, c_out, P), out_dtype),
        grid=(N, n_pb),
        in_specs=[
            pl.BlockSpec((None, c_in, tp), lambda n, p: (n, 0, p)),
            pl.BlockSpec((c_out, c_in), lambda n, p: (0, 0)),
            pl.BlockSpec((c_out, 1), lambda n, p: (0, 0)),
        ],
        out_specs=pl.BlockSpec((None, c_out, tp), lambda n, p: (n, 0, p)),
        compiler_params=pltpu.CompilerParams(
            dimension_semantics=("parallel", "parallel"),
            vmem_limit_bytes=budget + (8 << 20)),
        cost_estimate=cost,
    )(x_ncp, w_scaled, bias)


def _conv1x1_bn_strided(x4, sel, w_scaled, bias, *, c_out, wo, th, out_dtype,
                        budget):
    """x4: (N, C_in, Ho, s*W) super-row view; sel: (s*W, Wo) 0/1 selector."""
    N, c_in, Ho, sW = x4.shape
    n_rb = pl.cdiv(Ho, th)
    use_mxu = c_in > 8
    kernel = functools.partial(_conv_strided_kernel, c_in=c_in, th=th, wo=wo,
                               use_mxu=use_mxu)
    cost = pl.CostEstimate(
        flops=2 * N * Ho * wo * (c_in * sW + c_in * c_out),
        transcendentals=0,
        bytes_accessed=(x4.dtype.itemsize * N * c_in * Ho * sW
                        + jnp.dtype(out_dtype).itemsize * N * c_out * Ho * wo
                        + 4 * (c_in * c_out + c_out + sW * wo)))
    return pl.pallas_call(
        kernel,
        out_shape=jax.ShapeDtypeStruct((N, c_out, Ho * wo), out_dtype),
        grid=(N, n_rb),
        in_specs=[
            pl.BlockSpec((None, c_in, th, sW), lambda n, r: (n, 0, r, 0)),
            pl.BlockSpec((sW, wo), lambda n, r: (0, 0)),
            pl.BlockSpec((c_out, c_in), lambda n, r: (0, 0)),
            pl.BlockSpec((c_out, 1), lambda n, r: (0, 0)),
        ],
        out_specs=pl.BlockSpec((None, c_out, th * wo), lambda n, r: (n, 0, r)),
        compiler_params=pltpu.CompilerParams(
            dimension_semantics=("parallel", "parallel"),
            vmem_limit_bytes=budget + (8 << 20)),
        cost_estimate=cost,
    )(x4, sel, w_scaled, bias)


def _conv1x1_bn(x, w_scaled, bias, *, stride, out_dtype):
    N, c_in, H, W = x.shape
    c_out = w_scaled.shape[0]
    budget = _vmem_budget_bytes()
    itemsize = jnp.dtype(x.dtype).itemsize

    if stride > 1 and H % stride == 0:
        Ho = H // stride
        Wo = -(-W // stride)
        sW = stride * W
        th = _pick_row_tile(N, Ho, Wo, sW, c_in, c_out, itemsize, budget)
        if th is not None:
            # Free reshape: group every `stride` input rows into one super row.
            x4 = x.reshape(N, c_in, Ho, sW)
            sel = jnp.zeros((sW, Wo), jnp.float32)
            sel = sel.at[jnp.arange(Wo) * stride, jnp.arange(Wo)].set(1.0)
            y = _conv1x1_bn_strided(x4, sel, w_scaled, bias, c_out=c_out,
                                    wo=Wo, th=th, out_dtype=out_dtype,
                                    budget=budget)
            return y.reshape(N, c_out, Ho, Wo)

    # stride == 1, or the fused path is not applicable (odd H / oversized
    # weights): subsample in XLA first, then run the lane-dense stride-1
    # kernel on the flattened pixels.
    # TODO(synk): the odd-H strided fallback still pays one extra HBM pass.
    xs = x if stride == 1 else x[:, :, ::stride, ::stride]
    _, _, Ho, Wo = xs.shape
    P = Ho * Wo
    y = _conv1x1_bn_s1(xs.reshape(N, c_in, P), w_scaled, bias, c_out=c_out,
                       out_dtype=out_dtype, budget=budget)
    return y.reshape(N, c_out, Ho, Wo)


# ----------------------------------------------------------------------------
# Public forward
# ----------------------------------------------------------------------------
def skip_forward(x, params, *, C_in, C_out, stride, out_dtype=None):
    """Forward pass of Skip.  x: (N, C_in, H, W) in NCHW.

    Pass a bf16 `x` / `out_dtype=jnp.bfloat16` for opt-in bf16 streaming on
    v6e/v7x (halves HBM bytes; in-kernel math stays f32).
    """
    if C_in == C_out:
        # Identity(stride): pure strided subsample, no compute -> plain XLA.
        if stride == 1:
            return x
        return x[:, :, ::stride, ::stride]

    out_dtype = x.dtype if out_dtype is None else out_dtype
    w = params["conv_w"]               # (C_out, C_in, 1, 1)
    gamma = params["bn_gamma"]         # (C_out,)
    beta = params["bn_beta"]           # (C_out,)
    rmean = params["bn_running_mean"]  # (C_out,)
    rvar = params["bn_running_var"]    # (C_out,)
    eps = 1e-5

    # Fold eval-mode BatchNorm into the 1x1 conv weight and a per-channel bias.
    scale = gamma * jax.lax.rsqrt(rvar + eps)                  # (C_out,)
    w_scaled = (w[:, :, 0, 0] * scale[:, None]).astype(jnp.float32)
    bias = ((beta - rmean * scale)[:, None]).astype(jnp.float32)

    return _conv1x1_bn(x, w_scaled, bias, stride=stride, out_dtype=out_dtype)


def init_skip_params(key, C_in, C_out):
    """Deterministic parameter init (only used when C_in != C_out)."""
    (k_w,) = jax.random.split(key, 1)
    bound = 1.0 / jnp.sqrt(jnp.float32(C_in))
    conv_w = jax.random.uniform(k_w, (C_out, C_in, 1, 1), jnp.float32,
                                -bound, bound)
    return {
        "conv_w": conv_w,
        "bn_gamma": jnp.ones((C_out,), jnp.float32),
        "bn_beta": jnp.zeros((C_out,), jnp.float32),
        "bn_running_mean": jnp.zeros((C_out,), jnp.float32),
        "bn_running_var": jnp.ones((C_out,), jnp.float32),
    }


def _reference(x, params, stride):
    xs = x if stride == 1 else x[:, :, ::stride, ::stride]
    w2d = params["conv_w"][:, :, 0, 0]                       # (C_out, C_in)
    ref = jnp.einsum("nchw,oc->nohw", xs, w2d)
    scale = params["bn_gamma"] / jnp.sqrt(params["bn_running_var"] + 1e-5)
    bias = params["bn_beta"] - params["bn_running_mean"] * scale
    return ref * scale[None, :, None, None] + bias[None, :, None, None]


if __name__ == "__main__":
    key = jax.random.PRNGKey(0)
    kx, kp, kx2, kp2 = jax.random.split(key, 4)

    # TPU f32 matmuls may use bf16 MXU passes at default precision, so compare
    # with a tolerance that covers ~0.5% relative error.
    TOL = dict(atol=2e-2, rtol=2e-2)

    # Case 1: C_in != C_out, tiny channels (VPU small-K path), stride 2 ->
    # stride-fused kernel (no wrapper-side subsample pass).
    N, C_in, H, W = 2, 4, 16, 16
    C_out, stride = 8, 2
    x = jax.random.normal(kx, (N, C_in, H, W), jnp.float32)
    params = init_skip_params(kp, C_in, C_out)
    y = skip_forward(x, params, C_in=C_in, C_out=C_out, stride=stride)
    y = jax.block_until_ready(y)
    assert y.shape == (N, C_out, H // stride, W // stride), y.shape
    assert jnp.allclose(y, _reference(x, params, stride), **TOL)

    # Case 2: C_in != C_out, wider channels (MXU path), stride 1 ->
    # lane-dense flattened-pixel kernel.
    C_in2, C_out2 = 32, 64
    x2 = jax.random.normal(kx2, (N, C_in2, H, W), jnp.float32)
    params2 = init_skip_params(kp2, C_in2, C_out2)
    y2 = skip_forward(x2, params2, C_in=C_in2, C_out=C_out2, stride=1)
    y2 = jax.block_until_ready(y2)
    assert y2.shape == (N, C_out2, H, W), y2.shape
    assert jnp.allclose(y2, _reference(x2, params2, 1), **TOL)

    # Case 3: C_in == C_out -> Identity(stride) (strided slice, no compute).
    y_id = skip_forward(x, None, C_in=C_in, C_out=C_in, stride=2)
    y_id = jax.block_until_ready(y_id)
    assert jnp.array_equal(y_id, x[:, :, ::2, ::2])

    print("KERNEL_OK")
</pallas_src>

<mosaic_0001>
module attributes {stable_mosaic.version = 11 : i64} {
  func.func @_conv_strided_kernel(%arg0: i32, %arg1: i32, %arg2: memref<1x4x8x32xf32, #tpu.memory_space<vmem>>, %arg3: memref<32x8xf32, #tpu.memory_space<vmem>>, %arg4: memref<8x4xf32, #tpu.memory_space<vmem>>, %arg5: memref<8x1xf32, #tpu.memory_space<vmem>>, %arg6: memref<1x8x64xf32, #tpu.memory_space<vmem>>) attributes {dimension_semantics = [#tpu.dimension_semantics<parallel>, #tpu.dimension_semantics<parallel>], iteration_bounds = array<i64: 2, 1>, scalar_prefetch = 0 : i64, scratch_operands = 0 : i64, tpu.core_type = #tpu.core_type<tc>, window_params = [{transform_indices = @transform_0, window_bounds = array<i64: 1, 4, 8, 32>}, {pipeline_mode = #tpu.pipeline_mode<synchronous>, transform_indices = @transform_1, window_bounds = array<i64: 32, 8>}, {pipeline_mode = #tpu.pipeline_mode<synchronous>, transform_indices = @transform_2, window_bounds = array<i64: 8, 4>}, {pipeline_mode = #tpu.pipeline_mode<synchronous>, transform_indices = @transform_3, window_bounds = array<i64: 8, 1>}, {transform_indices = @transform_4, window_bounds = array<i64: 1, 8, 64>}]} {
    %c0 = arith.constant 0 : index
    %c0_0 = arith.constant 0 : index
    %0 = vector.load %arg4[%c0, %c0_0] : memref<8x4xf32, #tpu.memory_space<vmem>>, vector<8x4xf32>
    %c0_1 = arith.constant 0 : index
    %c0_2 = arith.constant 0 : index
    %1 = vector.load %arg3[%c0_1, %c0_2] : memref<32x8xf32, #tpu.memory_space<vmem>>, vector<32x8xf32>
    %c0_3 = arith.constant 0 : index
    %c0_4 = arith.constant 0 : index
    %2 = vector.load %arg5[%c0_3, %c0_4] : memref<8x1xf32, #tpu.memory_space<vmem>>, vector<8x1xf32>
    %c0_5 = arith.constant 0 : index
    %c0_6 = arith.constant 0 : index
    %c0_7 = arith.constant 0 : index
    %c0_8 = arith.constant 0 : index
    %3 = vector.load %arg2[%c0_5, %c0_6, %c0_7, %c0_8] : memref<1x4x8x32xf32, #tpu.memory_space<vmem>>, vector<1x4x1x32xf32>
    %4 = vector.shape_cast %3 : vector<1x4x1x32xf32> to vector<4x32xf32>
    %cst = arith.constant dense<0.000000e+00> : vector<4x8xf32>
    %5 = tpu.matmul %4, %1, %cst {dimension_numbers = #tpu.dot_dimension_numbers<[1], [0], [0], [1], [0, 0, 1, 1], [], []>} : vector<4x32xf32>, vector<32x8xf32>, vector<4x8xf32> -> vector<4x8xf32>
    %6 = vector.extract_strided_slice %0 {offsets = [0, 0], sizes = [8, 1], strides = [1, 1]} : vector<8x4xf32> to vector<8x1xf32>
    %7 = vector.extract_strided_slice %5 {offsets = [0, 0], sizes = [1, 8], strides = [1, 1]} : vector<4x8xf32> to vector<1x8xf32>
    %8 = vector.broadcast %6 : vector<8x1xf32> to vector<8x8xf32>
    %9 = vector.broadcast %7 : vector<1x8xf32> to vector<8x8xf32>
    %10 = arith.mulf %8, %9 : vector<8x8xf32>
    %11 = vector.extract_strided_slice %0 {offsets = [0, 1], sizes = [8, 1], strides = [1, 1]} : vector<8x4xf32> to vector<8x1xf32>
    %12 = vector.extract_strided_slice %5 {offsets = [1, 0], sizes = [1, 8], strides = [1, 1]} : vector<4x8xf32> to vector<1x8xf32>
    %13 = vector.broadcast %11 : vector<8x1xf32> to vector<8x8xf32>
    %14 = vector.broadcast %12 : vector<1x8xf32> to vector<8x8xf32>
    %15 = arith.mulf %13, %14 : vector<8x8xf32>
    %16 = arith.addf %10, %15 : vector<8x8xf32>
    %17 = vector.extract_strided_slice %0 {offsets = [0, 2], sizes = [8, 1], strides = [1, 1]} : vector<8x4xf32> to vector<8x1xf32>
    %18 = vector.extract_strided_slice %5 {offsets = [2, 0], sizes = [1, 8], strides = [1, 1]} : vector<4x8xf32> to vector<1x8xf32>
    %19 = vector.broadcast %17 : vector<8x1xf32> to vector<8x8xf32>
    %20 = vector.broadcast %18 : vector<1x8xf32> to vector<8x8xf32>
    %21 = arith.mulf %19, %20 : vector<8x8xf32>
    %22 = arith.addf %16, %21 : vector<8x8xf32>
    %23 = vector.extract_strided_slice %0 {offsets = [0, 3], sizes = [8, 1], strides = [1, 1]} : vector<8x4xf32> to vector<8x1xf32>
    %24 = vector.extract_strided_slice %5 {offsets = [3, 0], sizes = [1, 8], strides = [1, 1]} : vector<4x8xf32> to vector<1x8xf32>
    %25 = vector.broadcast %23 : vector<8x1xf32> to vector<8x8xf32>
    %26 = vector.broadcast %24 : vector<1x8xf32> to vector<8x8xf32>
    %27 = arith.mulf %25, %26 : vector<8x8xf32>
    %28 = arith.addf %22, %27 : vector<8x8xf32>
    %29 = vector.broadcast %2 : vector<8x1xf32> to vector<8x8xf32>
    %30 = arith.addf %28, %29 : vector<8x8xf32>
    %c0_9 = arith.constant 0 : index
    %c0_10 = arith.constant 0 : index
    %c0_11 = arith.constant 0 : index
    %31 = vector.load %arg6[%c0_9, %c0_10, %c0_11] : memref<1x8x64xf32, #tpu.memory_space<vmem>>, vector<1x8x8xf32>
    %32 = vector.shape_cast %31 : vector<1x8x8xf32> to vector<8x8xf32>
    %33 = vector.shape_cast %30 : vector<8x8xf32> to vector<1x8x8xf32>
    tpu.vector_store %arg6[%c0_9, %c0_10, %c0_11], %33 {strides = array<i32>} : memref<1x8x64xf32, #tpu.memory_space<vmem>>, vector<1x8x8xf32>,
    %c0_12 = arith.constant 0 : index
    %c0_13 = arith.constant 0 : index
    %c1 = arith.constant 1 : index
    %c0_14 = arith.constant 0 : index
    %34 = vector.load %arg2[%c0_12, %c0_13, %c1, %c0_14] : memref<1x4x8x32xf32, #tpu.memory_space<vmem>>, vector<1x4x1x32xf32>
    %35 = vector.shape_cast %34 : vector<1x4x1x32xf32> to vector<4x32xf32>
    %cst_15 = arith.constant dense<0.000000e+00> : vector<4x8xf32>
    %36 = tpu.matmul %35, %1, %cst_15 {dimension_numbers = #tpu.dot_dimension_numbers<[1], [0], [0], [1], [0, 0, 1, 1], [], []>} : vector<4x32xf32>, vector<32x8xf32>, vector<4x8xf32> -> vector<4x8xf32>
    %37 = vector.extract_strided_slice %0 {offsets = [0, 0], sizes = [8, 1], strides = [1, 1]} : vector<8x4xf32> to vector<8x1xf32>
    %38 = vector.extract_strided_slice %36 {offsets = [0, 0], sizes = [1, 8], strides = [1, 1]} : vector<4x8xf32> to vector<1x8xf32>
    %39 = vector.broadcast %37 : vector<8x1xf32> to vector<8x8xf32>
    %40 = vector.broadcast %38 : vector<1x8xf32> to vector<8x8xf32>
    %41 = arith.mulf %39, %40 : vector<8x8xf32>
    %42 = vector.extract_strided_slice %0 {offsets = [0, 1], sizes = [8, 1], strides = [1, 1]} : vector<8x4xf32> to vector<8x1xf32>
    %43 = vector.extract_strided_slice %36 {offsets = [1, 0], sizes = [1, 8], strides = [1, 1]} : vector<4x8xf32> to vector<1x8xf32>
    %44 = vector.broadcast %42 : vector<8x1xf32> to vector<8x8xf32>
    %45 = vector.broadcast %43 : vector<1x8xf32> to vector<8x8xf32>
    %46 = arith.mulf %44, %45 : vector<8x8xf32>
    %47 = arith.addf %41, %46 : vector<8x8xf32>
    %48 = vector.extract_strided_slice %0 {offsets = [0, 2], sizes = [8, 1], strides = [1, 1]} : vector<8x4xf32> to vector<8x1xf32>
    %49 = vector.extract_strided_slice %36 {offsets = [2, 0], sizes = [1, 8], strides = [1, 1]} : vector<4x8xf32> to vector<1x8xf32>
    %50 = vector.broadcast %48 : vector<8x1xf32> to vector<8x8xf32>
    %51 = vector.broadcast %49 : vector<1x8xf32> to vector<8x8xf32>
    %52 = arith.mulf %50, %51 : vector<8x8xf32>
    %53 = arith.addf %47, %52 : vector<8x8xf32>
    %54 = vector.extract_strided_slice %0 {offsets = [0, 3], sizes = [8, 1], strides = [1, 1]} : vector<8x4xf32> to vector<8x1xf32>
    %55 = vector.extract_strided_slice %36 {offsets = [3, 0], sizes = [1, 8], strides = [1, 1]} : vector<4x8xf32> to vector<1x8xf32>
    %56 = vector.broadcast %54 : vector<8x1xf32> to vector<8x8xf32>
    %57 = vector.broadcast %55 : vector<1x8xf32> to vector<8x8xf32>
    %58 = arith.mulf %56, %57 : vector<8x8xf32>
    %59 = arith.addf %53, %58 : vector<8x8xf32>
    %60 = vector.broadcast %2 : vector<8x1xf32> to vector<8x8xf32>
    %61 = arith.addf %59, %60 : vector<8x8xf32>
    %c0_16 = arith.constant 0 : index
    %c0_17 = arith.constant 0 : index
    %c8 = arith.constant 8 : index
    %62 = vector.load %arg6[%c0_16, %c0_17, %c8] : memref<1x8x64xf32, #tpu.memory_space<vmem>>, vector<1x8x8xf32>
    %63 = vector.shape_cast %62 : vector<1x8x8xf32> to vector<8x8xf32>
    %64 = vector.shape_cast %61 : vector<8x8xf32> to vector<1x8x8xf32>
    tpu.vector_store %arg6[%c0_16, %c0_17, %c8], %64 {strides = array<i32>} : memref<1x8x64xf32, #tpu.memory_space<vmem>>, vector<1x8x8xf32>,
    %c0_18 = arith.constant 0 : index
    %c0_19 = arith.constant 0 : index
    %c2 = arith.constant 2 : index
    %c0_20 = arith.constant 0 : index
    %65 = vector.load %arg2[%c0_18, %c0_19, %c2, %c0_20] : memref<1x4x8x32xf32, #tpu.memory_space<vmem>>, vector<1x4x1x32xf32>
    %66 = vector.shape_cast %65 : vector<1x4x1x32xf32> to vector<4x32xf32>
    %cst_21 = arith.constant dense<0.000000e+00> : vector<4x8xf32>
    %67 = tpu.matmul %66, %1, %cst_21 {dimension_numbers = #tpu.dot_dimension_numbers<[1], [0], [0], [1], [0, 0, 1, 1], [], []>} : vector<4x32xf32>, vector<32x8xf32>, vector<4x8xf32> -> vector<4x8xf32>
    %68 = vector.extract_strided_slice %0 {offsets = [0, 0], sizes = [8, 1], strides = [1, 1]} : vector<8x4xf32> to vector<8x1xf32>
    %69 = vector.extract_strided_slice %67 {offsets = [0, 0], sizes = [1, 8], strides = [1, 1]} : vector<4x8xf32> to vector<1x8xf32>
    %70 = vector.broadcast %68 : vector<8x1xf32> to vector<8x8xf32>
    %71 = vector.broadcast %69 : vector<1x8xf32> to vector<8x8xf32>
    %72 = arith.mulf %70, %71 : vector<8x8xf32>
    %73 = vector.extract_strided_slice %0 {offsets = [0, 1], sizes = [8, 1], strides = [1, 1]} : vector<8x4xf32> to vector<8x1xf32>
    %74 = vector.extract_strided_slice %67 {offsets = [1, 0], sizes = [1, 8], strides = [1, 1]} : vector<4x8xf32> to vector<1x8xf32>
    %75 = vector.broadcast %73 : vector<8x1xf32> to vector<8x8xf32>
    %76 = vector.broadcast %74 : vector<1x8xf32> to vector<8x8xf32>
    %77 = arith.mulf %75, %76 : vector<8x8xf32>
    %78 = arith.addf %72, %77 : vector<8x8xf32>
    %79 = vector.extract_strided_slice %0 {offsets = [0, 2], sizes = [8, 1], strides = [1, 1]} : vector<8x4xf32> to vector<8x1xf32>
    %80 = vector.extract_strided_slice %67 {offsets = [2, 0], sizes = [1, 8], strides = [1, 1]} : vector<4x8xf32> to vector<1x8xf32>
    %81 = vector.broadcast %79 : vector<8x1xf32> to vector<8x8xf32>
    %82 = vector.broadcast %80 : vector<1x8xf32> to vector<8x8xf32>
    %83 = arith.mulf %81, %82 : vector<8x8xf32>
    %84 = arith.addf %78, %83 : vector<8x8xf32>
    %85 = vector.extract_strided_slice %0 {offsets = [0, 3], sizes = [8, 1], strides = [1, 1]} : vector<8x4xf32> to vector<8x1xf32>
    %86 = vector.extract_strided_slice %67 {offsets = [3, 0], sizes = [1, 8], strides = [1, 1]} : vector<4x8xf32> to vector<1x8xf32>
    %87 = vector.broadcast %85 : vector<8x1xf32> to vector<8x8xf32>
    %88 = vector.broadcast %86 : vector<1x8xf32> to vector<8x8xf32>
    %89 = arith.mulf %87, %88 : vector<8x8xf32>
    %90 = arith.addf %84, %89 : vector<8x8xf32>
    %91 = vector.broadcast %2 : vector<8x1xf32> to vector<8x8xf32>
    %92 = arith.addf %90, %91 : vector<8x8xf32>
    %c0_22 = arith.constant 0 : index
    %c0_23 = arith.constant 0 : index
    %c16 = arith.constant 16 : index
    %93 = vector.load %arg6[%c0_22, %c0_23, %c16] : memref<1x8x64xf32, #tpu.memory_space<vmem>>, vector<1x8x8xf32>
    %94 = vector.shape_cast %93 : vector<1x8x8xf32> to vector<8x8xf32>
    %95 = vector.shape_cast %92 : vector<8x8xf32> to vector<1x8x8xf32>
    tpu.vector_store %arg6[%c0_22, %c0_23, %c16], %95 {strides = array<i32>} : memref<1x8x64xf32, #tpu.memory_space<vmem>>, vector<1x8x8xf32>,
    %c0_24 = arith.constant 0 : index
    %c0_25 = arith.constant 0 : index
    %c3 = arith.constant 3 : index
    %c0_26 = arith.constant 0 : index
    %96 = vector.load %arg2[%c0_24, %c0_25, %c3, %c0_26] : memref<1x4x8x32xf32, #tpu.memory_space<vmem>>, vector<1x4x1x32xf32>
    %97 = vector.shape_cast %96 : vector<1x4x1x32xf32> to vector<4x32xf32>
    %cst_27 = arith.constant dense<0.000000e+00> : vector<4x8xf32>
    %98 = tpu.matmul %97, %1, %cst_27 {dimension_numbers = #tpu.dot_dimension_numbers<[1], [0], [0], [1], [0, 0, 1, 1], [], []>} : vector<4x32xf32>, vector<32x8xf32>, vector<4x8xf32> -> vector<4x8xf32>
    %99 = vector.extract_strided_slice %0 {offsets = [0, 0], sizes = [8, 1], strides = [1, 1]} : vector<8x4xf32> to vector<8x1xf32>
    %100 = vector.extract_strided_slice %98 {offsets = [0, 0], sizes = [1, 8], strides = [1, 1]} : vector<4x8xf32> to vector<1x8xf32>
    %101 = vector.broadcast %99 : vector<8x1xf32> to vector<8x8xf32>
    %102 = vector.broadcast %100 : vector<1x8xf32> to vector<8x8xf32>
    %103 = arith.mulf %101, %102 : vector<8x8xf32>
    %104 = vector.extract_strided_slice %0 {offsets = [0, 1], sizes = [8, 1], strides = [1, 1]} : vector<8x4xf32> to vector<8x1xf32>
    %105 = vector.extract_strided_slice %98 {offsets = [1, 0], sizes = [1, 8], strides = [1, 1]} : vector<4x8xf32> to vector<1x8xf32>
    %106 = vector.broadcast %104 : vector<8x1xf32> to vector<8x8xf32>
    %107 = vector.broadcast %105 : vector<1x8xf32> to vector<8x8xf32>
    %108 = arith.mulf %106, %107 : vector<8x8xf32>
    %109 = arith.addf %103, %108 : vector<8x8xf32>
    %110 = vector.extract_strided_slice %0 {offsets = [0, 2], sizes = [8, 1], strides = [1, 1]} : vector<8x4xf32> to vector<8x1xf32>
    %111 = vector.extract_strided_slice %98 {offsets = [2, 0], sizes = [1, 8], strides = [1, 1]} : vector<4x8xf32> to vector<1x8xf32>
    %112 = vector.broadcast %110 : vector<8x1xf32> to vector<8x8xf32>
    %113 = vector.broadcast %111 : vector<1x8xf32> to vector<8x8xf32>
    %114 = arith.mulf %112, %113 : vector<8x8xf32>
    %115 = arith.addf %109, %114 : vector<8x8xf32>
    %116 = vector.extract_strided_slice %0 {offsets = [0, 3], sizes = [8, 1], strides = [1, 1]} : vector<8x4xf32> to vector<8x1xf32>
    %117 = vector.extract_strided_slice %98 {offsets = [3, 0], sizes = [1, 8], strides = [1, 1]} : vector<4x8xf32> to vector<1x8xf32>
    %118 = vector.broadcast %116 : vector<8x1xf32> to vector<8x8xf32>
    %119 = vector.broadcast %117 : vector<1x8xf32> to vector<8x8xf32>
    %120 = arith.mulf %118, %119 : vector<8x8xf32>
    %121 = arith.addf %115, %120 : vector<8x8xf32>
    %122 = vector.broadcast %2 : vector<8x1xf32> to vector<8x8xf32>
    %123 = arith.addf %121, %122 : vector<8x8xf32>
    %c0_28 = arith.constant 0 : index
    %c0_29 = arith.constant 0 : index
    %c24 = arith.constant 24 : index
    %124 = vector.load %arg6[%c0_28, %c0_29, %c24] : memref<1x8x64xf32, #tpu.memory_space<vmem>>, vector<1x8x8xf32>
    %125 = vector.shape_cast %124 : vector<1x8x8xf32> to vector<8x8xf32>
    %126 = vector.shape_cast %123 : vector<8x8xf32> to vector<1x8x8xf32>
    tpu.vector_store %arg6[%c0_28, %c0_29, %c24], %126 {strides = array<i32>} : memref<1x8x64xf32, #tpu.memory_space<vmem>>, vector<1x8x8xf32>,
    %c0_30 = arith.constant 0 : index
    %c0_31 = arith.constant 0 : index
    %c4 = arith.constant 4 : index
    %c0_32 = arith.constant 0 : index
    %127 = vector.load %arg2[%c0_30, %c0_31, %c4, %c0_32] : memref<1x4x8x32xf32, #tpu.memory_space<vmem>>, vector<1x4x1x32xf32>
    %128 = vector.shape_cast %127 : vector<1x4x1x32xf32> to vector<4x32xf32>
    %cst_33 = arith.constant dense<0.000000e+00> : vector<4x8xf32>
    %129 = tpu.matmul %128, %1, %cst_33 {dimension_numbers = #tpu.dot_dimension_numbers<[1], [0], [0], [1], [0, 0, 1, 1], [], []>} : vector<4x32xf32>, vector<32x8xf32>, vector<4x8xf32> -> vector<4x8xf32>
    %130 = vector.extract_strided_slice %0 {offsets = [0, 0], sizes = [8, 1], strides = [1, 1]} : vector<8x4xf32> to vector<8x1xf32>
    %131 = vector.extract_strided_slice %129 {offsets = [0, 0], sizes = [1, 8], strides = [1, 1]} : vector<4x8xf32> to vector<1x8xf32>
    %132 = vector.broadcast %130 : vector<8x1xf32> to vector<8x8xf32>
    %133 = vector.broadcast %131 : vector<1x8xf32> to vector<8x8xf32>
    %134 = arith.mulf %132, %133 : vector<8x8xf32>
    %135 = vector.extract_strided_slice %0 {offsets = [0, 1], sizes = [8, 1], strides = [1, 1]} : vector<8x4xf32> to vector<8x1xf32>
    %136 = vector.extract_strided_slice %129 {offsets = [1, 0], sizes = [1, 8], strides = [1, 1]} : vector<4x8xf32> to vector<1x8xf32>
    %137 = vector.broadcast %135 : vector<8x1xf32> to vector<8x8xf32>
    %138 = vector.broadcast %136 : vector<1x8xf32> to vector<8x8xf32>
    %139 = arith.mulf %137, %138 : vector<8x8xf32>
    %140 = arith.addf %134, %139 : vector<8x8xf32>
    %141 = vector.extract_strided_slice %0 {offsets = [0, 2], sizes = [8, 1], strides = [1, 1]} : vector<8x4xf32> to vector<8x1xf32>
    %142 = vector.extract_strided_slice %129 {offsets = [2, 0], sizes = [1, 8], strides = [1, 1]} : vector<4x8xf32> to vector<1x8xf32>
    %143 = vector.broadcast %141 : vector<8x1xf32> to vector<8x8xf32>
    %144 = vector.broadcast %142 : vector<1x8xf32> to vector<8x8xf32>
    %145 = arith.mulf %143, %144 : vector<8x8xf32>
    %146 = arith.addf %140, %145 : vector<8x8xf32>
    %147 = vector.extract_strided_slice %0 {offsets = [0, 3], sizes = [8, 1], strides = [1, 1]} : vector<8x4xf32> to vector<8x1xf32>
    %148 = vector.extract_strided_slice %129 {offsets = [3, 0], sizes = [1, 8], strides = [1, 1]} : vector<4x8xf32> to vector<1x8xf32>
    %149 = vector.broadcast %147 : vector<8x1xf32> to vector<8x8xf32>
    %150 = vector.broadcast %148 : vector<1x8xf32> to vector<8x8xf32>
    %151 = arith.mulf %149, %150 : vector<8x8xf32>
    %152 = arith.addf %146, %151 : vector<8x8xf32>
    %153 = vector.broadcast %2 : vector<8x1xf32> to vector<8x8xf32>
    %154 = arith.addf %152, %153 : vector<8x8xf32>
    %c0_34 = arith.constant 0 : index
    %c0_35 = arith.constant 0 : index
    %c32 = arith.constant 32 : index
    %155 = vector.load %arg6[%c0_34, %c0_35, %c32] : memref<1x8x64xf32, #tpu.memory_space<vmem>>, vector<1x8x8xf32>
    %156 = vector.shape_cast %155 : vector<1x8x8xf32> to vector<8x8xf32>
    %157 = vector.shape_cast %154 : vector<8x8xf32> to vector<1x8x8xf32>
    tpu.vector_store %arg6[%c0_34, %c0_35, %c32], %157 {strides = array<i32>} : memref<1x8x64xf32, #tpu.memory_space<vmem>>, vector<1x8x8xf32>,
    %c0_36 = arith.constant 0 : index
    %c0_37 = arith.constant 0 : index
    %c5 = arith.constant 5 : index
    %c0_38 = arith.constant 0 : index
    %158 = vector.load %arg2[%c0_36, %c0_37, %c5, %c0_38] : memref<1x4x8x32xf32, #tpu.memory_space<vmem>>, vector<1x4x1x32xf32>
    %159 = vector.shape_cast %158 : vector<1x4x1x32xf32> to vector<4x32xf32>
    %cst_39 = arith.constant dense<0.000000e+00> : vector<4x8xf32>
    %160 = tpu.matmul %159, %1, %cst_39 {dimension_numbers = #tpu.dot_dimension_numbers<[1], [0], [0], [1], [0, 0, 1, 1], [], []>} : vector<4x32xf32>, vector<32x8xf32>, vector<4x8xf32> -> vector<4x8xf32>
    %161 = vector.extract_strided_slice %0 {offsets = [0, 0], sizes = [8, 1], strides = [1, 1]} : vector<8x4xf32> to vector<8x1xf32>
    %162 = vector.extract_strided_slice %160 {offsets = [0, 0], sizes = [1, 8], strides = [1, 1]} : vector<4x8xf32> to vector<1x8xf32>
    %163 = vector.broadcast %161 : vector<8x1xf32> to vector<8x8xf32>
    %164 = vector.broadcast %162 : vector<1x8xf32> to vector<8x8xf32>
    %165 = arith.mulf %163, %164 : vector<8x8xf32>
    %166 = vector.extract_strided_slice %0 {offsets = [0, 1], sizes = [8, 1], strides = [1, 1]} : vector<8x4xf32> to vector<8x1xf32>
    %167 = vector.extract_strided_slice %160 {offsets = [1, 0], sizes = [1, 8], strides = [1, 1]} : vector<4x8xf32> to vector<1x8xf32>
    %168 = vector.broadcast %166 : vector<8x1xf32> to vector<8x8xf32>
    %169 = vector.broadcast %167 : vector<1x8xf32> to vector<8x8xf32>
    %170 = arith.mulf %168, %169 : vector<8x8xf32>
    %171 = arith.addf %165, %170 : vector<8x8xf32>
    %172 = vector.extract_strided_slice %0 {offsets = [0, 2], sizes = [8, 1], strides = [1, 1]} : vector<8x4xf32> to vector<8x1xf32>
    %173 = vector.extract_strided_slice %160 {offsets = [2, 0], sizes = [1, 8], strides = [1, 1]} : vector<4x8xf32> to vector<1x8xf32>
    %174 = vector.broadcast %172 : vector<8x1xf32> to vector<8x8xf32>
    %175 = vector.broadcast %173 : vector<1x8xf32> to vector<8x8xf32>
    %176 = arith.mulf %174, %175 : vector<8x8xf32>
    %177 = arith.addf %171, %176 : vector<8x8xf32>
    %178 = vector.extract_strided_slice %0 {offsets = [0, 3], sizes = [8, 1], strides = [1, 1]} : vector<8x4xf32> to vector<8x1xf32>
    %179 = vector.extract_strided_slice %160 {offsets = [3, 0], sizes = [1, 8], strides = [1, 1]} : vector<4x8xf32> to vector<1x8xf32>
    %180 = vector.broadcast %178 : vector<8x1xf32> to vector<8x8xf32>
    %181 = vector.broadcast %179 : vector<1x8xf32> to vector<8x8xf32>
    %182 = arith.mulf %180, %181 : vector<8x8xf32>
    %183 = arith.addf %177, %182 : vector<8x8xf32>
    %184 = vector.broadcast %2 : vector<8x1xf32> to vector<8x8xf32>
    %185 = arith.addf %183, %184 : vector<8x8xf32>
    %c0_40 = arith.constant 0 : index
    %c0_41 = arith.constant 0 : index
    %c40 = arith.constant 40 : index
    %186 = vector.load %arg6[%c0_40, %c0_41, %c40] : memref<1x8x64xf32, #tpu.memory_space<vmem>>, vector<1x8x8xf32>
    %187 = vector.shape_cast %186 : vector<1x8x8xf32> to vector<8x8xf32>
    %188 = vector.shape_cast %185 : vector<8x8xf32> to vector<1x8x8xf32>
    tpu.vector_store %arg6[%c0_40, %c0_41, %c40], %188 {strides = array<i32>} : memref<1x8x64xf32, #tpu.memory_space<vmem>>, vector<1x8x8xf32>,
    %c0_42 = arith.constant 0 : index
    %c0_43 = arith.constant 0 : index
    %c6 = arith.constant 6 : index
    %c0_44 = arith.constant 0 : index
    %189 = vector.load %arg2[%c0_42, %c0_43, %c6, %c0_44] : memref<1x4x8x32xf32, #tpu.memory_space<vmem>>, vector<1x4x1x32xf32>
    %190 = vector.shape_cast %189 : vector<1x4x1x32xf32> to vector<4x32xf32>
    %cst_45 = arith.constant dense<0.000000e+00> : vector<4x8xf32>
    %191 = tpu.matmul %190, %1, %cst_45 {dimension_numbers = #tpu.dot_dimension_numbers<[1], [0], [0], [1], [0, 0, 1, 1], [], []>} : vector<4x32xf32>, vector<32x8xf32>, vector<4x8xf32> -> vector<4x8xf32>
    %192 = vector.extract_strided_slice %0 {offsets = [0, 0], sizes = [8, 1], strides = [1, 1]} : vector<8x4xf32> to vector<8x1xf32>
    %193 = vector.extract_strided_slice %191 {offsets = [0, 0], sizes = [1, 8], strides = [1, 1]} : vector<4x8xf32> to vector<1x8xf32>
    %194 = vector.broadcast %192 : vector<8x1xf32> to vector<8x8xf32>
    %195 = vector.broadcast %193 : vector<1x8xf32> to vector<8x8xf32>
    %196 = arith.mulf %194, %195 : vector<8x8xf32>
    %197 = vector.extract_strided_slice %0 {offsets = [0, 1], sizes = [8, 1], strides = [1, 1]} : vector<8x4xf32> to vector<8x1xf32>
    %198 = vector.extract_strided_slice %191 {offsets = [1, 0], sizes = [1, 8], strides = [1, 1]} : vector<4x8xf32> to vector<1x8xf32>
    %199 = vector.broadcast %197 : vector<8x1xf32> to vector<8x8xf32>
    %200 = vector.broadcast %198 : vector<1x8xf32> to vector<8x8xf32>
    %201 = arith.mulf %199, %200 : vector<8x8xf32>
    %202 = arith.addf %196, %201 : vector<8x8xf32>
    %203 = vector.extract_strided_slice %0 {offsets = [0, 2], sizes = [8, 1], strides = [1, 1]} : vector<8x4xf32> to vector<8x1xf32>
    %204 = vector.extract_strided_slice %191 {offsets = [2, 0], sizes = [1, 8], strides = [1, 1]} : vector<4x8xf32> to vector<1x8xf32>
    %205 = vector.broadcast %203 : vector<8x1xf32> to vector<8x8xf32>
    %206 = vector.broadcast %204 : vector<1x8xf32> to vector<8x8xf32>
    %207 = arith.mulf %205, %206 : vector<8x8xf32>
    %208 = arith.addf %202, %207 : vector<8x8xf32>
    %209 = vector.extract_strided_slice %0 {offsets = [0, 3], sizes = [8, 1], strides = [1, 1]} : vector<8x4xf32> to vector<8x1xf32>
    %210 = vector.extract_strided_slice %191 {offsets = [3, 0], sizes = [1, 8], strides = [1, 1]} : vector<4x8xf32> to vector<1x8xf32>
    %211 = vector.broadcast %209 : vector<8x1xf32> to vector<8x8xf32>
    %212 = vector.broadcast %210 : vector<1x8xf32> to vector<8x8xf32>
    %213 = arith.mulf %211, %212 : vector<8x8xf32>
    %214 = arith.addf %208, %213 : vector<8x8xf32>
    %215 = vector.broadcast %2 : vector<8x1xf32> to vector<8x8xf32>
    %216 = arith.addf %214, %215 : vector<8x8xf32>
    %c0_46 = arith.constant 0 : index
    %c0_47 = arith.constant 0 : index
    %c48 = arith.constant 48 : index
    %217 = vector.load %arg6[%c0_46, %c0_47, %c48] : memref<1x8x64xf32, #tpu.memory_space<vmem>>, vector<1x8x8xf32>
    %218 = vector.shape_cast %217 : vector<1x8x8xf32> to vector<8x8xf32>
    %219 = vector.shape_cast %216 : vector<8x8xf32> to vector<1x8x8xf32>
    tpu.vector_store %arg6[%c0_46, %c0_47, %c48], %219 {strides = array<i32>} : memref<1x8x64xf32, #tpu.memory_space<vmem>>, vector<1x8x8xf32>,
    %c0_48 = arith.constant 0 : index
    %c0_49 = arith.constant 0 : index
    %c7 = arith.constant 7 : index
    %c0_50 = arith.constant 0 : index
    %220 = vector.load %arg2[%c0_48, %c0_49, %c7, %c0_50] : memref<1x4x8x32xf32, #tpu.memory_space<vmem>>, vector<1x4x1x32xf32>
    %221 = vector.shape_cast %220 : vector<1x4x1x32xf32> to vector<4x32xf32>
    %cst_51 = arith.constant dense<0.000000e+00> : vector<4x8xf32>
    %222 = tpu.matmul %221, %1, %cst_51 {dimension_numbers = #tpu.dot_dimension_numbers<[1], [0], [0], [1], [0, 0, 1, 1], [], []>} : vector<4x32xf32>, vector<32x8xf32>, vector<4x8xf32> -> vector<4x8xf32>
    %223 = vector.extract_strided_slice %0 {offsets = [0, 0], sizes = [8, 1], strides = [1, 1]} : vector<8x4xf32> to vector<8x1xf32>
    %224 = vector.extract_strided_slice %222 {offsets = [0, 0], sizes = [1, 8], strides = [1, 1]} : vector<4x8xf32> to vector<1x8xf32>
    %225 = vector.broadcast %223 : vector<8x1xf32> to vector<8x8xf32>
    %226 = vector.broadcast %224 : vector<1x8xf32> to vector<8x8xf32>
    %227 = arith.mulf %225, %226 : vector<8x8xf32>
    %228 = vector.extract_strided_slice %0 {offsets = [0, 1], sizes = [8, 1], strides = [1, 1]} : vector<8x4xf32> to vector<8x1xf32>
    %229 = vector.extract_strided_slice %222 {offsets = [1, 0], sizes = [1, 8], strides = [1, 1]} : vector<4x8xf32> to vector<1x8xf32>
    %230 = vector.broadcast %228 : vector<8x1xf32> to vector<8x8xf32>
    %231 = vector.broadcast %229 : vector<1x8xf32> to vector<8x8xf32>
    %232 = arith.mulf %230, %231 : vector<8x8xf32>
    %233 = arith.addf %227, %232 : vector<8x8xf32>
    %234 = vector.extract_strided_slice %0 {offsets = [0, 2], sizes = [8, 1], strides = [1, 1]} : vector<8x4xf32> to vector<8x1xf32>
    %235 = vector.extract_strided_slice %222 {offsets = [2, 0], sizes = [1, 8], strides = [1, 1]} : vector<4x8xf32> to vector<1x8xf32>
    %236 = vector.broadcast %234 : vector<8x1xf32> to vector<8x8xf32>
    %237 = vector.broadcast %235 : vector<1x8xf32> to vector<8x8xf32>
    %238 = arith.mulf %236, %237 : vector<8x8xf32>
    %239 = arith.addf %233, %238 : vector<8x8xf32>
    %240 = vector.extract_strided_slice %0 {offsets = [0, 3], sizes = [8, 1], strides = [1, 1]} : vector<8x4xf32> to vector<8x1xf32>
    %241 = vector.extract_strided_slice %222 {offsets = [3, 0], sizes = [1, 8], strides = [1, 1]} : vector<4x8xf32> to vector<1x8xf32>
    %242 = vector.broadcast %240 : vector<8x1xf32> to vector<8x8xf32>
    %243 = vector.broadcast %241 : vector<1x8xf32> to vector<8x8xf32>
    %244 = arith.mulf %242, %243 : vector<8x8xf32>
    %245 = arith.addf %239, %244 : vector<8x8xf32>
    %246 = vector.broadcast %2 : vector<8x1xf32> to vector<8x8xf32>
    %247 = arith.addf %245, %246 : vector<8x8xf32>
    %c0_52 = arith.constant 0 : index
    %c0_53 = arith.constant 0 : index
    %c56 = arith.constant 56 : index
    %248 = vector.load %arg6[%c0_52, %c0_53, %c56] : memref<1x8x64xf32, #tpu.memory_space<vmem>>, vector<1x8x8xf32>
    %249 = vector.shape_cast %248 : vector<1x8x8xf32> to vector<8x8xf32>
    %250 = vector.shape_cast %247 : vector<8x8xf32> to vector<1x8x8xf32>
    tpu.vector_store %arg6[%c0_52, %c0_53, %c56], %250 {strides = array<i32>} : memref<1x8x64xf32, #tpu.memory_space<vmem>>, vector<1x8x8xf32>,
    return
  }
  func.func @transform_0(%arg0: i32, %arg1: i32) -> (i32, i32, i32, i32) {
    %c0_i32 = arith.constant 0 : i32
    %c0_i32_0 = arith.constant 0 : i32
    %c0_i32_1 = arith.constant 0 : i32
    return %arg0, %c0_i32, %arg1, %c0_i32_0 : i32, i32, i32, i32
  }
  func.func @transform_1(%arg0: i32, %arg1: i32) -> (i32, i32) {
    %c0_i32 = arith.constant 0 : i32
    %c0_i32_0 = arith.constant 0 : i32
    %c0_i32_1 = arith.constant 0 : i32
    return %c0_i32, %c0_i32_0 : i32, i32
  }
  func.func @transform_2(%arg0: i32, %arg1: i32) -> (i32, i32) {
    %c0_i32 = arith.constant 0 : i32
    %c0_i32_0 = arith.constant 0 : i32
    %c0_i32_1 = arith.constant 0 : i32
    return %c0_i32, %c0_i32_0 : i32, i32
  }
  func.func @transform_3(%arg0: i32, %arg1: i32) -> (i32, i32) {
    %c0_i32 = arith.constant 0 : i32
    %c0_i32_0 = arith.constant 0 : i32
    %c0_i32_1 = arith.constant 0 : i32
    return %c0_i32, %c0_i32_0 : i32, i32
  }
  func.func @transform_4(%arg0: i32, %arg1: i32) -> (i32, i32, i32) {
    %c0_i32 = arith.constant 0 : i32
    %c0_i32_0 = arith.constant 0 : i32
    return %arg0, %c0_i32, %arg1 : i32, i32, i32
  }
}

</mosaic_0001>

<bundles_post_ra>
// kernel: tpu_custom_call.1
= control target key start
LH: loop header
LB: loop body
LE: loop exit
PB: predicated region body
PF: predicated region fallthrough
CT: control target
= control target key end

     0   :  { %9 = vsyncpa [#allocation3], 0  ;;  %s2146_s0 = inlined_call_operand.hbm [shape: f32[2,4,8,32], index: 0, kind: input, shape index: {}]   ;;  %s2147_s1 = inlined_call_operand.vmem [shape: f32[32,8], index: 1, kind: input, shape index: {}]   ;;  %s2148_s2 = inlined_call_operand.vmem [shape: f32[8,4], index: 2, kind: input, shape index: {}]   ;;  %s2149_s3 = inlined_call_operand.vmem [shape: f32[8,1], index: 3, kind: input, shape index: {}]   ;;  %s2150_s4 = inlined_call_operand.hbm [shape: f32[2,8,64], index: 4, kind: output, shape index: {}]  }
   0x1   :  { %11 = vsyncpa [#allocation3 + $0x1], 0 }
   0x2   :  { %12 = vsyncpa [#allocation4], 0 }
   0x3   :  { %14 = vsyncpa [#allocation4 + $0x1], 0  ;;  %s1725_s15 = smov 0   ;;  %s1727_s16 = smov 0  }
   0x4   :  { %s1729_s17 = smov 0   ;;  %s1731_s18 = smov 0  }
   0x5   :  { %s1733_s19 = smov 0   ;;  %s1735_s20 = smov 0  }
   0x6 LB: > { %s1285_s21 = sadd.s32 4294967295, %s1680_s20   ;;  %s1286_s22 = sadd.s32 4294967294, %s1680_s20   ;;  %s1680_s20 = sphi %s1735_s20, %s20_s20   ;;  %s1676_s19 = sphi %s1733_s19, %s2165_s19   ;;  %s1672_s18 = sphi %s1731_s18, %s2164_s18   ;;  %s1668_s17 = sphi %s1729_s17, %s2163_s17   ;;  %s1664_s16 = sphi %s1727_s16, %s2162_s16   ;;  %s1660_s15 = sphi %s1725_s15, %s2161_s15  }
   0x7   : > { %s32_s23 = sadd.s32 1, %s1676_s19  ;;  %s41_s24 = sadd.s32 1, %s1668_s17 }
   0x8   : > { %p34_p0 = scmp.ge.s32.totalorder %s32_s23, 2  ;;  %p48_p1 = scmp.ne.s32.totalorder %s1668_s17, %s1664_s16 }
   0x9   : > { %p49_p2 = scmp.eq.s32.totalorder %s1680_s20, 0  ;;  %p54_p3 = scmp.ne.s32.totalorder %s1664_s16, %s1660_s15 }
   0xa   : > { %s2167_s23 = smov (%p34_p0, %s32_s23), 0  ;;  %p55_p5 = scmp.eq.s32.totalorder %s1285_s21, 0 }
   0xb   : > { %p1766_p4 = por %p49_p2, %p48_p1  ;;  %s36_s26 = ssub.s32 %s1676_s19, %s2167_s23 }
   0xc   : > { %p143_p6 = scmp.eq.s32.totalorder %s1285_s21, 1  ;;  %p39_p7 = scmp.eq.s32.totalorder %s36_s26, 0 }
   0xd   : > { %p1772_p8 = por %p55_p5, %p54_p3  ;;  %p149_p10 = scmp.eq.s32.totalorder %s1286_s22, 1 }
   0xe   : > { %p1776_p9 = por %p143_p6, %p48_p1  ;;  %p1496_p13 = scmp.lt.s32.totalorder %s1680_s20, 2 }
   0xf   : > { %s1781_s29 = scalar_select %p39_p7, %s1668_s17, %s41_s24  }
  0x10   : > { %s2154_s28 = scalar_select %p1776_p9, 1, 0 }
  0x11   : > { %p1783_p11 = por %p149_p10, %p54_p3  ;;  %s178_s5 = sand.u32 1, %s1668_s17  }
  0x12   : > { %s1289_s6 = sshll.u32 %s178_s5, 5  ;;  %s1307_s7 = sshll.u32 %s1676_s19, 9 }
  0x13   : > { %s2155_s30 = scalar_select %p1783_p11, 1, 0 }
  0x14   : > { %s1794_s10 = scalar_lea.hbm %s2146_s0, %s1307_s7  ;;  %s182_s11 = scalar_lea.vmem [#allocation2], %s1289_s6 }
  0x15   : > { %s190_s12 = sshll.u32 %s182_s11, 4  ;;  %p1800_p0 = pnand %p1496_p13, %p1766_p4  ;;  %s1796_s12 = int_to_ptr.vmem [resolvable:$true] %s190_s12 }
  0x16   : > { %s1805_s14 = scalar_lea.sflag [#allocation3], %s178_s5  ;;  %s1568_s21 = scalar_lea.hbm %s1794_s10, 512 }
  0x17   : > { %p1569_p2 = scmp.ne.s32.totalorder %s1794_s10, %s1568_s21  ;;  %p1570_p3 = pneg %p1800_p0 }
  0x18   : > { %s1573_s25 = scalar_lea.hbm %s2146_s0, 1024  ;;  %p1574_p4 = scmp.lt.u32.totalorder %s1794_s10, %s2146_s0 }
  0x19   : > { %p1571_p5 = pnand %p1570_p3, %p1569_p2  ;;  %p1575_p7 = scmp.lt.u32.totalorder %s1573_s25, %s1568_s21 }
  0x1a   : > { %p1577_p13 = scmp.lt.u32.totalorder %s1568_s21, %s1794_s10 }
  0x1b   : > { %p1572_p6 = pneg %p1571_p5  ;;  %p1576_p10 = por %p1575_p7, %p1574_p4 }
  0x1d   : > { %p1578_p12 = por %p1577_p13, %p1576_p10 }
  0x1f   : > { %p1579_p1 = pnand %p1578_p12, %p1572_p6 }
  0x21   : > { %1582 = shalt.err (!%p1579_p1)
}
  0x22   : > { %s1583_s5 = scalar_lea.vmem %s1796_s12, 512  ;;  %s1682_s7 = smov [#allocation2]  }
  0x23   : > { %p1584_p2 = scmp.ne.s32.totalorder %s1796_s12, %s1583_s5  ;;  %s1588_s8 = sshll.u32 %s1682_s7, 4  ;;  %s1589_s8 = int_to_ptr.vmem [resolvable:$false] %s1588_s8 }
  0x24   : > { %s1590_s9 = scalar_lea.vmem %s1589_s8, 1024  ;;  %p1591_p9 = scmp.lt.s32.totalorder %s1796_s12, %s1589_s8 }
  0x25   : > { %p1586_p5 = pnand %p1584_p2, %p1570_p3  ;;  %p1592_p4 = scmp.lt.s32.totalorder %s1590_s9, %s1583_s5 }
  0x27   : > { %p1587_p11 = pneg %p1586_p5  ;;  %p1593_p7 = por %p1592_p4, %p1591_p9 }
  0x29   : > { %p1594_p10 = pnand %p1593_p7, %p1587_p11 }
  0x2b   : > { %1597 = shalt.err (!%p1594_p10)
}
  0x2c   : > { %s1683_s11 = smov 128   ;;  %s1684_s21 = smov 8  }
  0x2d   : > { %1491 = dma.hbm_to_vmem [thread:$0]  (!%p1800_p0), %s1794_s10, 512, %s1796_s12, %s1805_s14, %s1683_s11, %s1683_s11, %s1684_s21  }
  0x2e   : > { %p198_p12 = scmp.lt.s32.totalorder %s1680_s20, 3  ;;  %p2157_p1 = scmp.ge.s32.totalorder %s1680_s20, 1 }
  0x30   : > { %p199_p3 = pnand %p2157_p1, %p198_p12 }
  0x31   : > { %s1837_s22 = sand.u32 (!%p199_p3), 1, %s1664_s16  }
  0x32   : > { %202 = sbr.rel (%p199_p3) target bundleno = 447 (0x1bf), region = 36  ;;  %s1293_s24 = sshll.u32 (!%p199_p3), %s1837_s22, 5 }
  0x33   : > { %s205_s25 = scalar_lea.sflag (!%p199_p3), [#allocation3], %s1837_s22  ;;  %s1841_s26 = scalar_lea.vmem (!%p199_p3), [#allocation2], %s1293_s24 }
  0x39   : > { %1651 = dma.done.wait (%p1772_p8), %s205_s25, 512  }
  0x3a   : > { %1653 = vsyncadd (%p1772_p8), %s205_s25, 4294966784  ;;  %v1685_v0 = vmov 0.0|0.0   ;;  %vm1686_vm0 = vmmov 0   ;;  %v1687_v1 = vmov 0.0   ;;  %v1688_v2 = vmov 0   ;;  %v234_v4 = vld [vmem:[%s2147_s1] sm:$0xff] }
  0x3b   : > { %1436 = vmatprep.subr.bf16.mxu0 %v1685_v0  ;;  %1442 = vmatprep.subr.bf16.mxu1 %v1685_v0  ;;  %v1689_v3 = vmov 2   ;;  %v235_v5 = vld [vmem:[%s2147_s1 + $0x8] sm:$0xff]  ;;  %v236_v6 = vld [vmem:[%s2147_s1 + $0x10] sm:$0xff]  ;;  %vm248_vm1 = vcmask 1041409   ;;  %vm251_vm2 = vcmask 1042434   ;;  %v237_v8 = vld [vmem:[%s2147_s1 + $0x18] sm:$0xff] }
  0x3c   : > { %1356 = vmatprep.mubr.msk.f32.mxu0 %vm1686_vm0, %v1687_v1  ;;  %1367 = vmatprep.mubr.msk.f32.mxu1 %vm1686_vm0, %v1687_v1  ;;  %v1863_v7 = vpack.c.bf16 %v235_v5, %v234_v4  ;;  %v239_v9 = vld [vmem:[%s1841_s26] sm:$0x1]  ;;  %v240_v10 = vld [vmem:[%s1841_s26 + $0x8] sm:$0x1]  ;;  %vm254_vm3 = vcmask 1043459   ;;  %v1879_v15 = vpack.c.bf16 %v237_v8, %v236_v6  ;;  %vm256_vm4 = vcmask 261120  }
  0x3d   : > { %1562 = vset.pattern.permute.xlu0 %v1688_v2  ;;  %1564 = vset.pattern.permute.xlu1 %v1689_v3  ;;  %v241_v11 = vld [vmem:[%s1841_s26 + $0x10] sm:$0x1]  ;;  %v242_v12 = vld [vmem:[%s1841_s26 + $0x18] sm:$0x1]  ;;  %v247_v13 = vrot.slane %v240_v10, 7  ;;  %v1875_v14 = vld [vmem:[%s2148_s2] sm:$0xff] }
  0x3e   : > { %1438 = vmatpush3.bf16.msra.mxu0 %v1863_v7  ;;  %1444 = vmatpush3.bf16.msra.mxu1 %v1863_v7  ;;  %v250_v16 = vrot.slane %v241_v11, 6  ;;  %v253_v17 = vrot.slane %v242_v12, 5  ;;  %v377_v18 = vld [vmem:[%s1841_s26 + $0x1] sm:$0x1]  ;;  %v378_v19 = vld [vmem:[%s1841_s26 + $0x9] sm:$0x1] }
  0x3f   : > { %1439 = vmatprep.subr.bf16.mxu0 %v1685_v0  ;;  %1445 = vmatprep.subr.bf16.mxu1 %v1685_v0  ;;  %v249_v20 = vsel %vm248_vm1, %v247_v13, %v239_v9  ;;  %v379_v21 = vld [vmem:[%s1841_s26 + $0x11] sm:$0x1]  ;;  %v380_v22 = vld [vmem:[%s1841_s26 + $0x19] sm:$0x1]  ;;  %v385_v23 = vrot.slane %v378_v19, 7  ;;  %v1690_v44 = vmov 1  }
  0x40   : > { %v252_v24 = vsel %vm251_vm2, %v250_v16, %v249_v20  ;;  %v387_v25 = vrot.slane %v379_v21, 6  ;;  %v389_v26 = vrot.slane %v380_v22, 5  ;;  %v494_v27 = vld [vmem:[%s1841_s26 + $0xa] sm:$0x1]  ;;  %331 = vperm.xlu0 %1562, %v1875_v14   ;;  %350 = vperm.xlu1 %1564, %v1875_v14   ;;  %v493_v29 = vld [vmem:[%s1841_s26 + $0x2] sm:$0x1] }
  0x41   : > { %v386_v28 = vsel %vm248_vm1, %v385_v23, %v377_v18  ;;  %v495_v30 = vld [vmem:[%s1841_s26 + $0x12] sm:$0x1]  ;;  %v501_v31 = vrot.slane %v494_v27, 7  ;;  %v255_v32 = vsel %vm254_vm3, %v253_v17, %v252_v24  ;;  %v496_v34 = vld [vmem:[%s1841_s26 + $0x1a] sm:$0x1]  ;;  %v1691_v45 = vmov 3  }
  0x42   : > { %1441 = vmatpush3.bf16.msra.mxu0 %v1879_v15  ;;  %1447 = vmatpush3.bf16.msra.mxu1 %v1879_v15  ;;  %v388_v33 = vsel %vm251_vm2, %v387_v25, %v386_v28  ;;  %v609_v35 = vld [vmem:[%s1841_s26 + $0x3] sm:$0x1]  ;;  %v610_v36 = vld [vmem:[%s1841_s26 + $0xb] sm:$0x1]  ;;  %v503_v38 = vrot.slane %v495_v30, 6  ;;  %v505_v48 = vrot.slane %v496_v34, 5 }
  0x43   : > { %v390_v37 = vsel %vm254_vm3, %v389_v26, %v388_v33  ;;  %1448 = vmatprep.subr.bf16.mxu0 %v1685_v0  ;;  %1454 = vmatprep.subr.bf16.mxu1 %v1685_v0  ;;  %v611_v39 = vld [vmem:[%s1841_s26 + $0x13] sm:$0x1]  ;;  %v612_v40 = vld [vmem:[%s1841_s26 + $0x1b] sm:$0x1]  ;;  %v617_v41 = vrot.slane %v610_v36, 7  ;;  %v502_v42 = vsel %vm248_vm1, %v501_v31, %v493_v29  ;;  %v238_v20 = vld [vmem:[%s2149_s3] sm:$0xff] }
  0x44   : > { %v619_v43 = vrot.slane %v611_v39, 6  ;;  %1563 = vset.pattern.permute.xlu0 %v1690_v44  ;;  %1565 = vset.pattern.permute.xlu1 %v1691_v45  ;;  %v726_v47 = vld [vmem:[%s1841_s26 + $0xc] sm:$0x1]  ;;  %v621_v49 = vrot.slane %v612_v40, 5  ;;  %v842_v50 = vld [vmem:[%s1841_s26 + $0xd] sm:$0x1]  ;;  %v504_v51 = vsel %vm251_vm2, %v503_v38, %v502_v42 }
  0x45   : > { %1357 = vmatmul.mubr.msk.f32.vlgmr.msra.gmra.mrb[0].mxu0 %vm256_vm4, %v255_v32  ;;  %1368 = vmatmul.mubr.msk.f32.vlgmr.msra.gmra.mrb[0].mxu1 %vm256_vm4, %v390_v37  ;;  %v618_v46 = vsel %vm248_vm1, %v617_v41, %v609_v35  ;;  %v727_v53 = vld [vmem:[%s1841_s26 + $0x14] sm:$0x1]  ;;  %v733_v54 = vrot.slane %v726_v47, 7  ;;  %v843_v55 = vld [vmem:[%s1841_s26 + $0x15] sm:$0x1]  ;;  %v849_v56 = vrot.slane %v842_v50, 7  ;;  %v506_v59 = vsel %vm254_vm3, %v505_v48, %v504_v51 }
  0x46   : > { %1450 = vmatpush3.bf16.msra.mxu0 %v1863_v7  ;;  %1456 = vmatpush3.bf16.msra.mxu1 %v1863_v7  ;;  %v620_v52 = vsel %vm251_vm2, %v619_v43, %v618_v46  ;;  %v725_v57 = vld [vmem:[%s1841_s26 + $0x4] sm:$0x1]  ;;  %v841_v58 = vld [vmem:[%s1841_s26 + $0x5] sm:$0x1]  ;;  %v728_v61 = vld [vmem:[%s1841_s26 + $0x1c] sm:$0x1] }
  0x47   : > { %1451 = vmatprep.subr.bf16.mxu0 %v1685_v0  ;;  %1457 = vmatprep.subr.bf16.mxu1 %v1685_v0  ;;  %v622_v60 = vsel %vm254_vm3, %v621_v49, %v620_v52  ;;  %v735_v62 = vrot.slane %v727_v53, 6  ;;  %v844_v63 = vld [vmem:[%s1841_s26 + $0x1d] sm:$0x1]  ;;  %v851_v3 = vrot.slane %v843_v55, 6  ;;  %v734_v4 = vsel %vm248_vm1, %v733_v54, %v725_v57  ;;  %v958_v6 = vld [vmem:[%s1841_s26 + $0xe] sm:$0x1] }
  0x48   : > { %1378 = vmatprep.mubr.msk.f32.mxu0 %vm1686_vm0, %v1687_v1  ;;  %1389 = vmatprep.mubr.msk.f32.mxu1 %vm1686_vm0, %v1687_v1  ;;  %v850_v5 = vsel %vm248_vm1, %v849_v56, %v841_v58  ;;  %v1074_v8 = vld [vmem:[%s1841_s26 + $0xf] sm:$0x1]  ;;  %v737_v9 = vrot.slane %v728_v61, 5  ;;  %v853_v10 = vrot.slane %v844_v63, 5  ;;  %v959_v13 = vld [vmem:[%s1841_s26 + $0x16] sm:$0x1] }
  0x49   : > { %340 = vperm.xlu0 %1563, %v1875_v14   ;;  %360 = vperm.xlu1 %1565, %v1875_v14   ;;  %v736_v11 = vsel %vm251_vm2, %v735_v62, %v734_v4  ;;  %v852_v12 = vsel %vm251_vm2, %v851_v3, %v850_v5  ;;  %v965_v14 = vrot.slane %v958_v6, 7  ;;  %v1075_v16 = vld [vmem:[%s1841_s26 + $0x17] sm:$0x1]  ;;  %v1081_v17 = vrot.slane %v1074_v8, 7  ;;  %v957_v18 = vld [vmem:[%s1841_s26 + $0x6] sm:$0x1] }
  0x4a   : > { %1453 = vmatpush3.bf16.msra.mxu0 %v1879_v15  ;;  %1459 = vmatpush3.bf16.msra.mxu1 %v1879_v15  ;;  %v1073_v19 = vld [vmem:[%s1841_s26 + $0x7] sm:$0x1]  ;;  %v738_v21 = vsel %vm254_vm3, %v737_v9, %v736_v11  ;;  %v854_v22 = vsel %vm254_vm3, %v853_v10, %v852_v12  ;;  %v960_v23 = vld [vmem:[%s1841_s26 + $0x1e] sm:$0x1]  ;;  %v967_v24 = vrot.slane %v959_v13, 6  ;;  %v1083_v26 = vrot.slane %v1075_v16, 6 }
  0x4b   : > { %1460 = vmatprep.subr.bf16.mxu0 %v1685_v0  ;;  %1466 = vmatprep.subr.bf16.mxu1 %v1685_v0  ;;  %v1076_v25 = vld [vmem:[%s1841_s26 + $0x1f] sm:$0x1]  ;;  %v966_v27 = vsel %vm248_vm1, %v965_v14, %v957_v18  ;;  %v969_v28 = vrot.slane %v960_v23, 5  ;;  %s1294_s24 = sshll.u32 %s1837_s22, 3  ;;  %vm375_vm5 = vcmask 64512   ;;  %s1692_s25 = smov 8  }
  0x4c   : > { %v1085_v29 = vrot.slane %v1076_v25, 5  ;;  %v968_v30 = vsel %vm251_vm2, %v967_v24, %v966_v27  ;;  %s2043_s26 = scalar_lea.vmem [#allocation5], %s1294_s24  ;;  %s1693_s27 = smov 16   ;;  %vm491_vm6 = vcmask 130112   ;;  %vm607_vm7 = vcmask 195712  }
  0x4d   : > { %1379 = vmatmul.mubr.msk.f32.vlgmr.msra.gmra.mrb[2].mxu0 %vm256_vm4, %v506_v59  ;;  %1390 = vmatmul.mubr.msk.f32.vlgmr.msra.gmra.mrb[2].mxu1 %vm256_vm4, %v622_v60  ;;  %s1694_s10 = smov 24   ;;  %s1695_s12 = smov 32   ;;  %vm723_vm8 = vcmask 261312   ;;  %vm839_vm9 = vcmask 326912   ;;  %vm955_vm10 = vcmask 392512   ;;  %vm1071_vm11 = vcmask 458112  }
  0x4e   : > { %1462 = vmatpush3.bf16.msra.mxu0 %v1863_v7  ;;  %1468 = vmatpush3.bf16.msra.mxu1 %v1863_v7  ;;  %s1696_s13 = smov 40   ;;  %s1697_s14 = smov 48   ;;  %vm1187_vm12 = vcmask 523712  }
  0x4f   : > { %1463 = vmatprep.subr.bf16.mxu0 %v1685_v0  ;;  %1469 = vmatprep.subr.bf16.mxu1 %v1685_v0  ;;  %s1698_s6 = smov 56   ;;  %s1304_s5 = sshll.u32 %s1672_s18, 7 }
  0x50   : > { %1400 = vmatprep.mubr.msk.f32.mxu0 %vm1686_vm0, %v1687_v1  ;;  %1411 = vmatprep.mubr.msk.f32.mxu1 %vm1686_vm0, %v1687_v1  ;;  %s1204_s7 = sshll.u32 %s2043_s26, 4  ;;  %s2095_s11 = scalar_lea.hbm %s2150_s4, %s1304_s5  ;;  %s2097_s7 = int_to_ptr.vmem [resolvable:$true] %s1204_s7 }
  0x51   : > { %1566 = vset.pattern.permute.xlu1 %v1688_v2  ;;  %1567 = vset.pattern.permute.xlu0 %v1688_v2  ;;  %v1082_v2 = vsel %vm248_vm1, %v1081_v17, %v1073_v19  ;;  %s1190_s21 = scalar_lea.sflag [#allocation4], %s1837_s22  ;;  %s1598_s18 = scalar_lea.vmem %s2097_s7, 128 }
  0x52   : > { %1465 = vmatpush3.bf16.msra.mxu0 %v1879_v15  ;;  %1471 = vmatpush3.bf16.msra.mxu1 %v1879_v15  ;;  %v1084_v31 = vsel %vm251_vm2, %v1083_v26, %v1082_v2  ;;  %p1599_p8 = scmp.ne.s32.totalorder %s2097_s7, %s1598_s18  ;;  %p2158_p9 = scmp.ne.s32.totalorder %s2154_s28, 0 }
  0x53   : > { %1472 = vmatprep.subr.bf16.mxu0 %v1685_v0  ;;  %1478 = vmatprep.subr.bf16.mxu1 %v1685_v0  ;;  %v1086_v32 = vsel %vm254_vm3, %v1085_v29, %v1084_v31  ;;  %s1699_s24 = smov [#allocation5]  }
  0x54   : > { %371 = vperm.xlu1 %1566, %v238_v20   ;;  %p1600_p11 = pnand %p1599_p8, %p2158_p9 }
  0x55   : > { %1401 = vmatmul.mubr.msk.f32.vlgmr.msra.gmra.mrb[4].mxu0 %vm256_vm4, %v738_v21  ;;  %1412 = vmatmul.mubr.msk.f32.vlgmr.msra.gmra.mrb[4].mxu1 %vm256_vm4, %v854_v22 }
  0x56   : > { %1474 = vmatpush3.bf16.msra.mxu0 %v1863_v7  ;;  %1480 = vmatpush3.bf16.msra.mxu1 %v1863_v7  ;;  %v970_v7 = vsel %vm254_vm3, %v969_v28, %v968_v30  ;;  %p1601_p0 = pneg %p1600_p11 }
  0x57   : > { %1475 = vmatprep.subr.bf16.mxu0 %v1685_v0  ;;  %1481 = vmatprep.subr.bf16.mxu1 %v1685_v0  ;;  %v334_v0 = vlaneseq }
  0x58   : > { %1422 = vmatprep.mubr.msk.f32.mxu0 %vm1686_vm0, %v1687_v1  ;;  %1433 = vmatprep.mubr.msk.f32.mxu1 %vm1686_vm0, %v1687_v1 }
  0x59   : > { %v335_v34 = vshrl.u32 %v334_v0, 7 }
  0x5a   : > { %1477 = vmatpush3.bf16.msra.mxu0 %v1879_v15  ;;  %1483 = vmatpush3.bf16.msra.mxu1 %v1879_v15 }
  0x5b   : > { %v1992_v35 = vsub.s32 0, %v335_v34  ;;  %v1994_v36 = vsub.s32 1, %v335_v34  ;;  %v1996_v1 = vsub.s32 2, %v335_v34  ;;  %v2009_v49 = vsub.s32 3, %v335_v34 }
  0x5d   : > { %1423 = vmatmul.mubr.msk.f32.vlgmr.msra.gmra.mrb[6].mxu0 %vm256_vm4, %v970_v7  ;;  %1434 = vmatmul.mubr.msk.f32.vlgmr.msra.gmra.mrb[6].mxu1 %vm256_vm4, %v1086_v32 }
  0xbf   : > { %v1990_v33 = vpop.permute.xlu0 %331  ;;  %v1998_v37 = vpop.permute.xlu1 %350 }
  0xc8   : > { %v2000_v15 = vpop.permute.xlu0 %340  ;;  %v2018_v59 = vpop.permute.xlu1 %360 }
  0xd3   : > { %v2034_v20 = vpop.permute.xlu1 %371 }
 0x118   : > { %v325_v38 = vpop.f32.mrb[0].mxu0  ;;  %v459_v39 = vpop.f32.mrb[0].mxu1 }
 0x119   : > { %v337_v40 = vrot.slane %v325_v38, %v1992_v35  ;;  %v346_v41 = vrot.slane %v325_v38, %v1994_v36  ;;  %v356_v42 = vrot.slane %v325_v38, %v1996_v1  ;;  %v1358_v43 = vpop.f32.mrb[1].mxu0  ;;  %v1369_v44 = vpop.f32.mrb[1].mxu1  ;;  %v466_v45 = vrot.slane %v459_v39, %v1992_v35 }
 0x11a   : > { %v471_v46 = vrot.slane %v459_v39, %v1994_v36  ;;  %v477_v47 = vrot.slane %v459_v39, %v1996_v1  ;;  %v366_v57 = vrot.slane %v325_v38, %v2009_v49  ;;  %v483_v58 = vrot.slane %v459_v39, %v2009_v49 }
 0x11b   : > { %v338_v48 = vmul.f32 %v337_v40, %v1990_v33  ;;  %v347_v50 = vmul.f32 %v346_v41, %v2000_v15  ;;  %v357_v51 = vmul.f32 %v356_v42, %v1998_v37  ;;  %v467_v52 = vmul.f32 %v466_v45, %v1990_v33 }
 0x11c   : > { %v472_v53 = vmul.f32 %v471_v46, %v2000_v15  ;;  %v478_v54 = vmul.f32 %v477_v47, %v1998_v37  ;;  %v367_v12 = vmul.f32 %v366_v57, %v2018_v59  ;;  %v484_v16 = vmul.f32 %v483_v58, %v2018_v59 }
 0x11d   : > { %v348_v55 = vadd.f32 %v347_v50, %v338_v48 }
 0x11e   : > { %v473_v56 = vadd.f32 %v472_v53, %v467_v52 }
 0x11f   : > { %v358_v62 = vadd.f32 %v357_v51, %v348_v55 }
 0x120   : > { %v575_v60 = vpop.f32.mrb[2].mxu0  ;;  %v691_v61 = vpop.f32.mrb[2].mxu1  ;;  %v479_v8 = vadd.f32 %v478_v54, %v473_v56 }
 0x121   : > { %v582_v63 = vrot.slane %v575_v60, %v1992_v35  ;;  %v587_v3 = vrot.slane %v575_v60, %v1994_v36  ;;  %v593_v4 = vrot.slane %v575_v60, %v1996_v1  ;;  %v1380_v5 = vpop.f32.mrb[3].mxu0  ;;  %v1391_v6 = vpop.f32.mrb[3].mxu1  ;;  %v698_v9 = vrot.slane %v691_v61, %v1992_v35 }
 0x122   : > { %v703_v10 = vrot.slane %v691_v61, %v1994_v36  ;;  %v709_v11 = vrot.slane %v691_v61, %v1996_v1  ;;  %v368_v23 = vadd.f32 %v367_v12, %v358_v62  ;;  %v485_v24 = vadd.f32 %v484_v16, %v479_v8 }
 0x123   : > { %v583_v13 = vmul.f32 %v582_v63, %v1990_v33  ;;  %v588_v14 = vmul.f32 %v587_v3, %v2000_v15  ;;  %v594_v17 = vmul.f32 %v593_v4, %v1998_v37  ;;  %v699_v18 = vmul.f32 %v698_v9, %v1990_v33 }
 0x124   : > { %v704_v19 = vmul.f32 %v703_v10, %v2000_v15  ;;  %v710_v22 = vmul.f32 %v709_v11, %v1998_v37  ;;  %v599_v26 = vrot.slane %v575_v60, %v2009_v49  ;;  %v715_v27 = vrot.slane %v691_v61, %v2009_v49 }
 0x125   : > { %v589_v21 = vadd.f32 %v588_v14, %v583_v13  ;;  %v374_v2 = vadd.f32 %v2034_v20, %v368_v23  ;;  %v486_v28 = vadd.f32 %v485_v24, %v2034_v20 }
 0x126   : > { %v705_v25 = vadd.f32 %v704_v19, %v699_v18  ;;  %v600_v43 = vmul.f32 %v599_v26, %v2018_v59  ;;  %v716_v44 = vmul.f32 %v715_v27, %v2018_v59 }
 0x127   : > { %488 = vrot.lane.b32.xlu0 %v486_v28, %s1692_s25  ;;  %v595_v34 = vadd.f32 %v594_v17, %v589_v21  ;;  %376 = vst.msk [vmem:[%s2043_s26] sm:$0xff] %vm375_vm5, %v374_v2  ;;  %s1602_s25 = sshll.u32 %s1699_s24, 4  ;;  %s1603_s25 = int_to_ptr.vmem [resolvable:$false] %s1602_s25 }
 0x128   : > { %v807_v29 = vpop.f32.mrb[4].mxu0  ;;  %v923_v30 = vpop.f32.mrb[4].mxu1  ;;  %v711_v38 = vadd.f32 %v710_v22, %v705_v25  ;;  %p1605_p6 = scmp.lt.s32.totalorder %s2097_s7, %s1603_s25 }
 0x129   : > { %v814_v31 = vrot.slane %v807_v29, %v1992_v35  ;;  %v819_v7 = vrot.slane %v807_v29, %v1994_v36  ;;  %v1402_v32 = vpop.f32.mrb[5].mxu0  ;;  %v1413_v0 = vpop.f32.mrb[5].mxu1  ;;  %v825_v39 = vrot.slane %v807_v29, %v1996_v1  ;;  %v930_v40 = vrot.slane %v923_v30, %v1992_v35 }
 0x12a   : > { %v935_v41 = vrot.slane %v923_v30, %v1994_v36  ;;  %v941_v42 = vrot.slane %v923_v30, %v1996_v1  ;;  %v601_v51 = vadd.f32 %v600_v43, %v595_v34  ;;  %v717_v52 = vadd.f32 %v716_v44, %v711_v38 }
 0x12b   : > { %v815_v45 = vmul.f32 %v814_v31, %v1990_v33  ;;  %v820_v46 = vmul.f32 %v819_v7, %v2000_v15  ;;  %v931_v47 = vmul.f32 %v930_v40, %v1990_v33  ;;  %v826_v53 = vmul.f32 %v825_v39, %v1998_v37 }
 0x12c   : > { %v936_v48 = vmul.f32 %v935_v41, %v2000_v15  ;;  %v831_v54 = vrot.slane %v807_v29, %v2009_v49  ;;  %v942_v56 = vmul.f32 %v941_v42, %v1998_v37  ;;  %v947_v57 = vrot.slane %v923_v30, %v2009_v49 }
 0x12d   : > { %v821_v50 = vadd.f32 %v820_v46, %v815_v45  ;;  %v602_v58 = vadd.f32 %v601_v51, %v2034_v20  ;;  %v718_v60 = vadd.f32 %v717_v52, %v2034_v20 }
 0x12e   : > { %v937_v55 = vadd.f32 %v936_v48, %v931_v47  ;;  %v832_v10 = vmul.f32 %v831_v54, %v2018_v59  ;;  %v948_v14 = vmul.f32 %v947_v57, %v2018_v59 }
 0x12f   : > { %v827_v63 = vadd.f32 %v826_v53, %v821_v50  ;;  %604 = vrot.lane.b32.xlu1 %v602_v58, %s1693_s27  ;;  %720 = vrot.lane.b32.xlu0 %v718_v60, %s1694_s10  ;;  %s1604_s27 = scalar_lea.vmem %s1603_s25, 256 }
 0x130   : > { %v1039_v61 = vpop.f32.mrb[6].mxu0  ;;  %v1155_v62 = vpop.f32.mrb[6].mxu1  ;;  %v943_v3 = vadd.f32 %v942_v56, %v937_v55  ;;  %p1606_p13 = scmp.lt.s32.totalorder %s1604_s27, %s1598_s18 }
 0x131   : > { %v1046_v4 = vrot.slane %v1039_v61, %v1992_v35  ;;  %v1051_v5 = vrot.slane %v1039_v61, %v1994_v36  ;;  %v1057_v6 = vrot.slane %v1039_v61, %v1996_v1  ;;  %v1424_v8 = vpop.f32.mrb[7].mxu0  ;;  %v1435_v9 = vpop.f32.mrb[7].mxu1  ;;  %v1162_v11 = vrot.slane %v1155_v62, %v1992_v35 }
 0x132   : > { %v1167_v12 = vrot.slane %v1155_v62, %v1994_v36  ;;  %v1173_v13 = vrot.slane %v1155_v62, %v1996_v1  ;;  %v1063_v18 = vrot.slane %v1039_v61, %v2009_v49  ;;  %v1179_v22 = vrot.slane %v1155_v62, %v2009_v49  ;;  %p1607_p2 = por %p1606_p13, %p1605_p6 }
 0x133   : > { %v1047_v16 = vmul.f32 %v1046_v4, %v1990_v33  ;;  %v1052_v17 = vmul.f32 %v1051_v5, %v2000_v15  ;;  %v1163_v19 = vmul.f32 %v1162_v11, %v1990_v33  ;;  %v1058_v35 = vmul.f32 %v1057_v6, %v1998_v37 }
 0x134   : > { %v1168_v21 = vmul.f32 %v1167_v12, %v2000_v15  ;;  %v833_v36 = vadd.f32 %v832_v10, %v827_v63  ;;  %v949_v24 = vadd.f32 %v948_v14, %v943_v3  ;;  %v1174_v25 = vmul.f32 %v1173_v13, %v1998_v37  ;;  %p1608_p5 = pnand %p1607_p2, %p1601_p0 }
 0x135   : > { %v1053_v23 = vadd.f32 %v1052_v17, %v1047_v16  ;;  %v1064_v26 = vmul.f32 %v1063_v18, %v2018_v59  ;;  %v1180_v33 = vmul.f32 %v1179_v22, %v2018_v59 }
 0x136   : > { %v1169_v1 = vadd.f32 %v1168_v21, %v1163_v19  ;;  %v834_v27 = vadd.f32 %v833_v36, %v2034_v20  ;;  %v950_v2 = vadd.f32 %v949_v24, %v2034_v20 }
 0x137   : > { %v1059_v28 = vadd.f32 %v1058_v35, %v1053_v23 }
 0x138   : > { %v1175_v15 = vadd.f32 %v1174_v25, %v1169_v1  ;;  %836 = vrot.lane.b32.xlu1 %v834_v27, %s1695_s12  ;;  %952 = vrot.lane.b32.xlu0 %v950_v2, %s1696_s13 }
 0x139   : > { %v1065_v49 = vadd.f32 %v1064_v26, %v1059_v28 }
 0x13a   : > { %v1181_v29 = vadd.f32 %v1180_v33, %v1175_v15 }
 0x13b   : > { %v1066_v37 = vadd.f32 %v1065_v49, %v2034_v20 }
 0x13c   : > { %v1182_v30 = vadd.f32 %v1181_v29, %v2034_v20 }
 0x13d   : > { %1068 = vrot.lane.b32.xlu1 %v1066_v37, %s1697_s14 }
 0x13e   : > { %1184 = vrot.lane.b32.xlu0 %v1182_v30, %s1698_s6 }
 0x199   : > { %v489_v59 = vpop.permute.xlu0 %488 }
 0x19a   : > { %492 = vst.msk [vmem:[%s2043_s26] sm:$0xff] %vm491_vm6, %v489_v59 }
 0x1a1   : > { %v605_v31 = vpop.permute.xlu1 %604  ;;  %v721_v7 = vpop.permute.xlu0 %720 }
 0x1a2   : > { %608 = vst.msk [vmem:[%s2043_s26] sm:$0xff] %vm607_vm7, %v605_v31 }
 0x1a3   : > { %724 = vst.msk [vmem:[%s2043_s26] sm:$0xff] %vm723_vm8, %v721_v7 }
 0x1aa   : > { %v837_v20 = vpop.permute.xlu1 %836  ;;  %v953_v32 = vpop.permute.xlu0 %952 }
 0x1ab   : > { %840 = vst.msk [vmem:[%s2043_s26] sm:$0xff] %vm839_vm9, %v837_v20 }
 0x1ac   : > { %956 = vst.msk [vmem:[%s2043_s26] sm:$0xff] %vm955_vm10, %v953_v32 }
 0x1af   : > { %v1069_v0 = vpop.permute.xlu1 %1068 }
 0x1b0   : > { %1072 = vst.msk [vmem:[%s2043_s26] sm:$0xff] %vm1071_vm11, %v1069_v0  ;;  %v1185_v34 = vpop.permute.xlu0 %1184 }
 0x1b1   : > { %1188 = vst.msk [vmem:[%s2043_s26] sm:$0xff] %vm1187_vm12, %v1185_v34 }
 0x1b2   : > { %1611 = shalt.err (!%p1608_p5)
}
 0x1b3   : > { %s1612_s22 = scalar_lea.hbm %s2095_s11, 128  ;;  %s1616_s12 = scalar_lea.hbm %s2150_s4, 256 }
 0x1b4   : > { %p1613_p4 = scmp.ne.s32.totalorder %s2095_s11, %s1612_s22  ;;  %p1617_p12 = scmp.lt.u32.totalorder %s2095_s11, %s2150_s4 }
 0x1b5   : > { %p1618_p1 = scmp.lt.u32.totalorder %s1616_s12, %s1612_s22  ;;  %p1620_p8 = scmp.lt.u32.totalorder %s1612_s22, %s2095_s11 }
 0x1b6   : > { %p1614_p7 = pnand %p1613_p4, %p2158_p9 }
 0x1b7   : > { %p1619_p3 = por %p1618_p1, %p1617_p12 }
 0x1b8   : > { %p1615_p10 = pneg %p1614_p7 }
 0x1b9   : > { %p1621_p11 = por %p1620_p8, %p1619_p3 }
 0x1bb   : > { %p1622_p0 = pnand %p1621_p11, %p1615_p10 }
 0x1bd   : > { %1625 = shalt.err (!%p1622_p0)
}
 0x1be   : > { %1486 = dma.vmem_to_hbm [thread:$0]  (%p2158_p9), %s2097_s7, 128, %s2095_s11, %s1190_s21  }
 0x1bf PF: > { %s1216_s6 = sand.u32 1, %s1660_s15   ;;  %p2159_p6 = scmp.ne.s32.totalorder %s2155_s30, 0 }
 0x1c0   : > { %p2160_p13 = scmp.ge.s32.totalorder %s1680_s20, 2  ;;  %s1217_s5 = scalar_lea.sflag [#allocation4], %s1216_s6 }
 0x1c2   : > { %p1493_p2 = pnand %p2160_p13, %p2159_p6 }
 0x1c4   : > { %1655 = dma.done.wait (!%p1493_p2), %s1217_s5, 128  }
 0x1c5   : > { %1657 = vsyncadd (!%p1493_p2), %s1217_s5, 4294967168  ;;  %s20_s20 = sadd.s32 1, %s1680_s20   ;;  %s2161_s15 = smov %s1664_s16 }
 0x1c6   : > { %p17_p5 = scmp.ge.s32.totalorder %s20_s20, 4   ;;  %s2162_s16 = smov %s1668_s17 }
 0x1c7   : > { %s2163_s17 = smov %s1781_s29  ;;  %s2164_s18 = smov %s1676_s19 }
 0x1c8   : > { %s2165_s19 = smov %s2167_s23  ;;  %19 = sbr.rel (!%p17_p5) target bundleno = 6 (0x6), region = 81 }
 0x1cf   :  { %1222 = vsyncpa [#allocation3], 1 }
 0x1d0   :  { %1224 = vsyncpa [#allocation3 + $0x1], 1 }
 0x1d1   :  { %1225 = vsyncpa [#allocation4], 1 }
 0x1d2   :  { %1227 = vsyncpa [#allocation4 + $0x1], 1 }

</bundles_post_ra>
